<compile_context>
chip_gen: v6e
topology: v6e:2x2x1
jax: 0.10.0
libtpu: 0.0.40
codegen_flags: <defaults>
</compile_context>

<pallas_src>
import jax
import jax.numpy as jnp
from jax.experimental import pallas as pl
from jax.experimental.pallas import tpu as pltpu


_LEAKY_SLOPE = 0.0001


def _round_up(n, m):
    return ((n + m - 1) // m) * m


def _leaky_relu(x):
    # slope in (0,1): max(x, slope*x) == LeakyReLU, single VALU op (no cmp+sel).
    return jnp.maximum(x, _LEAKY_SLOPE * x)


def _softplus(x):
    # numerically stable softplus: max(x, 0) + log1p(exp(-|x|))
    return jnp.maximum(x, 0.0) + jnp.log1p(jnp.exp(-jnp.abs(x)))


def actor_kernel(x_ref,
                 w1_ref, b1_ref,
                 w2_ref, b2_ref,
                 w3_ref, b3_ref,
                 wh_ref, bh_ref,
                 mu_ref, sg_ref):
    x = x_ref[...]  # bf16 [TB, IN_P]

    # fc1 + LeakyReLU(0.0001)  (bf16 MXU inputs, f32 accumulate + epilogue)
    h = jnp.dot(x, w1_ref[...], preferred_element_type=jnp.float32) + b1_ref[...]
    h = _leaky_relu(h)

    # fc2 + LeakyReLU(0.0001)
    h = jnp.dot(h.astype(jnp.bfloat16), w2_ref[...],
                preferred_element_type=jnp.float32) + b2_ref[...]
    h = _leaky_relu(h)

    # fc3 + LeakyReLU(0.0001)
    h = jnp.dot(h.astype(jnp.bfloat16), w3_ref[...],
                preferred_element_type=jnp.float32) + b3_ref[...]
    h = _leaky_relu(h)

    # Fused mu/sigma head: one matmul over concatenated [wmu | wsg] (padded to
    # a full 128-lane block). Apply both nonlinearities to the whole lane-dense
    # block; the wrapper slices the real columns (mu from the first half,
    # sigma from the second half) afterwards, so padded-lane values never leak.
    head = jnp.dot(h.astype(jnp.bfloat16), wh_ref[...],
                   preferred_element_type=jnp.float32) + bh_ref[...]

    mu_ref[...] = jnp.tanh(head)
    sg_ref[...] = _softplus(head)

    # TODO(synk): torch.isnan(sigma[0,0]) print-side-effect has no kernel
    # equivalent; NaN check can be done on the returned sigma in host JAX.


def actor_network_forward(x, params):
    """Runs the ActorNetwork forward pass in one Pallas call.

    x: [B, input_size] float32
    params: dict with w1,b1,w2,b2,w3,b3,wmu,bmu,wsg,bsg
            (weights stored [in_features, out_features], biases [1, out])
    returns: (mu [B, action_size], sigma [B, action_size]) in float32
    """
    B, in_features = x.shape
    hidden = params["w1"].shape[1]
    action_size = params["wmu"].shape[1]

    # Lane-dense padded feature dims.
    IN_P = _round_up(in_features, 128)
    H_P = _round_up(hidden, 128)
    HEAD_P = _round_up(2 * action_size, 128)

    # Batch tile: v7x-safe (well under the 32 MiB scoped VMEM default even
    # with double-buffered activation/output blocks) while still large enough
    # to fill the 256-wide MXU and amortize per-step grid overhead.
    if B <= 512:
        TB = _round_up(max(B, 8), 8)
        B_P = TB
    else:
        TB = 512
        B_P = _round_up(B, TB)

    def pad2(a, rows, cols, dtype):
        a = a.astype(dtype)
        return jnp.pad(a, ((0, rows - a.shape[0]), (0, cols - a.shape[1])))

    # bf16 operands for the MXU; biases stay f32 (added to f32 accumulator).
    x_p = pad2(x, B_P, IN_P, jnp.bfloat16)
    w1 = pad2(params["w1"], IN_P, H_P, jnp.bfloat16)
    w2 = pad2(params["w2"], H_P, H_P, jnp.bfloat16)
    w3 = pad2(params["w3"], H_P, H_P, jnp.bfloat16)
    wh = pad2(jnp.concatenate([params["wmu"], params["wsg"]], axis=1),
              H_P, HEAD_P, jnp.bfloat16)
    b1 = pad2(params["b1"], 1, H_P, jnp.float32)
    b2 = pad2(params["b2"], 1, H_P, jnp.float32)
    b3 = pad2(params["b3"], 1, H_P, jnp.float32)
    bh = pad2(jnp.concatenate([params["bmu"], params["bsg"]], axis=1),
              1, HEAD_P, jnp.float32)

    grid = (B_P // TB,)

    def resident(a):
        # Constant index_map: weights/biases stay resident in VMEM across the
        # batch grid (no re-DMA per step).
        return pl.BlockSpec(a.shape, lambda i: (0, 0))

    in_specs = [
        pl.BlockSpec((TB, IN_P), lambda i: (i, 0)),   # x, tiled over batch
        resident(w1), resident(b1),
        resident(w2), resident(b2),
        resident(w3), resident(b3),
        resident(wh), resident(bh),
    ]
    out_specs = (
        pl.BlockSpec((TB, HEAD_P), lambda i: (i, 0)),
        pl.BlockSpec((TB, HEAD_P), lambda i: (i, 0)),
    )
    out_shape = (
        jax.ShapeDtypeStruct((B_P, HEAD_P), jnp.float32),
        jax.ShapeDtypeStruct((B_P, HEAD_P), jnp.float32),
    )

    flops = 2 * B_P * (IN_P * H_P + 2 * H_P * H_P + H_P * HEAD_P)
    transcendentals = 3 * B_P * HEAD_P  # tanh + exp + log1p per head element
    bytes_accessed = (
        x_p.size * 2
        + (w1.size + w2.size + w3.size + wh.size) * 2
        + (b1.size + b2.size + b3.size + bh.size) * 4
        + 2 * B_P * HEAD_P * 4
    )

    mu_full, sg_full = pl.pallas_call(
        actor_kernel,
        out_shape=out_shape,
        grid=grid,
        in_specs=in_specs,
        out_specs=out_specs,
        compiler_params=pltpu.CompilerParams(
            dimension_semantics=("parallel",)),   # megacore-shard batch on v7x
        cost_estimate=pl.CostEstimate(
            flops=flops,
            transcendentals=transcendentals,
            bytes_accessed=bytes_accessed),
    )(x_p, w1, b1, w2, b2, w3, b3, wh, bh)

    mu = mu_full[:B, :action_size]
    sigma = sg_full[:B, action_size:2 * action_size]
    return mu, sigma


def init_params(key, input_size, hidden_size=100, action_size=1):
    """Deterministic synthetic init (PyTorch-Linear-style uniform bounds)."""
    ks = jax.random.split(key, 10)

    def linear(kw, kb, fan_in, fan_out):
        bound = 1.0 / jnp.sqrt(jnp.float32(fan_in))
        w = jax.random.uniform(kw, (fan_in, fan_out), jnp.float32, -bound, bound)
        b = jax.random.uniform(kb, (1, fan_out), jnp.float32, -bound, bound)
        return w, b

    w1, b1 = linear(ks[0], ks[1], input_size, hidden_size)
    w2, b2 = linear(ks[2], ks[3], hidden_size, hidden_size)
    w3, b3 = linear(ks[4], ks[5], hidden_size, hidden_size)
    wmu, bmu = linear(ks[6], ks[7], hidden_size, action_size)
    wsg, bsg = linear(ks[8], ks[9], hidden_size, action_size)
    return dict(w1=w1, b1=b1, w2=w2, b2=b2, w3=w3, b3=b3,
                wmu=wmu, bmu=bmu, wsg=wsg, bsg=bsg)


def reference_forward(x, p, compute_dtype=jnp.float32):
    """Pure-JAX reference. compute_dtype=bfloat16 mirrors the kernel's MXU
    numerics (bf16 operands, f32 accumulation, f32 epilogue)."""
    def dot(a, w):
        return jnp.dot(a.astype(compute_dtype), w.astype(compute_dtype),
                       preferred_element_type=jnp.float32)

    h = _leaky_relu(dot(x, p["w1"]) + p["b1"])
    h = _leaky_relu(dot(h, p["w2"]) + p["b2"])
    h = _leaky_relu(dot(h, p["w3"]) + p["b3"])
    mu = jnp.tanh(dot(h, p["wmu"]) + p["bmu"])
    sigma = jax.nn.softplus(dot(h, p["wsg"]) + p["bsg"])
    return mu, sigma


if __name__ == "__main__":
    key = jax.random.PRNGKey(0)
    k_x, k_p = jax.random.split(key)

    batch = 8
    input_size = 16
    hidden_size = 100   # PyTorch default (non-128-aligned on purpose)
    action_size = 1

    x = jax.random.normal(k_x, (batch, input_size), dtype=jnp.float32)
    params = init_params(k_p, input_size, hidden_size, action_size)

    mu, sigma = actor_network_forward(x, params)
    mu, sigma = jax.block_until_ready((mu, sigma))

    # Tight check vs a reference that mirrors the kernel's bf16/f32 numerics.
    mu_bf, sg_bf = reference_forward(x, params, compute_dtype=jnp.bfloat16)
    # Loose sanity check vs the pure-f32 reference.
    mu_f32, sg_f32 = reference_forward(x, params, compute_dtype=jnp.float32)

    assert mu.shape == (batch, action_size)
    assert sigma.shape == (batch, action_size)
    assert jnp.allclose(mu, mu_bf, atol=1e-3, rtol=1e-3)
    assert jnp.allclose(sigma, sg_bf, atol=1e-3, rtol=1e-3)
    assert jnp.allclose(mu, mu_f32, atol=5e-2, rtol=5e-2)
    assert jnp.allclose(sigma, sg_f32, atol=5e-2, rtol=5e-2)
    assert bool(jnp.all(sigma > 0))

    print("KERNEL_OK")
</pallas_src>

<mosaic_0001>
module attributes {stable_mosaic.version = 11 : i64} {
  func.func @actor_kernel(%arg0: i32, %arg1: memref<8x128xbf16, #tpu.memory_space<vmem>>, %arg2: memref<128x128xbf16, #tpu.memory_space<vmem>>, %arg3: memref<1x128xf32, #tpu.memory_space<vmem>>, %arg4: memref<128x128xbf16, #tpu.memory_space<vmem>>, %arg5: memref<1x128xf32, #tpu.memory_space<vmem>>, %arg6: memref<128x128xbf16, #tpu.memory_space<vmem>>, %arg7: memref<1x128xf32, #tpu.memory_space<vmem>>, %arg8: memref<128x128xbf16, #tpu.memory_space<vmem>>, %arg9: memref<1x128xf32, #tpu.memory_space<vmem>>, %arg10: memref<8x128xf32, #tpu.memory_space<vmem>>, %arg11: memref<8x128xf32, #tpu.memory_space<vmem>>) attributes {dimension_semantics = [#tpu.dimension_semantics<parallel>], iteration_bounds = array<i64: 1>, scalar_prefetch = 0 : i64, scratch_operands = 0 : i64, tpu.core_type = #tpu.core_type<tc>, window_params = [{transform_indices = @transform_0, window_bounds = array<i64: 8, 128>}, {pipeline_mode = #tpu.pipeline_mode<synchronous>, transform_indices = @transform_1, window_bounds = array<i64: 128, 128>}, {pipeline_mode = #tpu.pipeline_mode<synchronous>, transform_indices = @transform_2, window_bounds = array<i64: 1, 128>}, {pipeline_mode = #tpu.pipeline_mode<synchronous>, transform_indices = @transform_3, window_bounds = array<i64: 128, 128>}, {pipeline_mode = #tpu.pipeline_mode<synchronous>, transform_indices = @transform_4, window_bounds = array<i64: 1, 128>}, {pipeline_mode = #tpu.pipeline_mode<synchronous>, transform_indices = @transform_5, window_bounds = array<i64: 128, 128>}, {pipeline_mode = #tpu.pipeline_mode<synchronous>, transform_indices = @transform_6, window_bounds = array<i64: 1, 128>}, {pipeline_mode = #tpu.pipeline_mode<synchronous>, transform_indices = @transform_7, window_bounds = array<i64: 128, 128>}, {pipeline_mode = #tpu.pipeline_mode<synchronous>, transform_indices = @transform_8, window_bounds = array<i64: 1, 128>}, {transform_indices = @transform_9, window_bounds = array<i64: 8, 128>}, {transform_indices = @transform_10, window_bounds = array<i64: 8, 128>}]} {
    %c0 = arith.constant 0 : index
    %c0_0 = arith.constant 0 : index
    %0 = vector.load %arg1[%c0, %c0_0] : memref<8x128xbf16, #tpu.memory_space<vmem>>, vector<8x128xbf16>
    %c0_1 = arith.constant 0 : index
    %c0_2 = arith.constant 0 : index
    %1 = vector.load %arg2[%c0_1, %c0_2] : memref<128x128xbf16, #tpu.memory_space<vmem>>, vector<128x128xbf16>
    %cst = arith.constant dense<0.000000e+00> : vector<8x128xf32>
    %2 = tpu.matmul %0, %1, %cst {dimension_numbers = #tpu.dot_dimension_numbers<[1], [0], [0], [1], [0, 0, 1, 1], [], []>} : vector<8x128xbf16>, vector<128x128xbf16>, vector<8x128xf32> -> vector<8x128xf32>
    %c0_3 = arith.constant 0 : index
    %c0_4 = arith.constant 0 : index
    %3 = vector.load %arg3[%c0_3, %c0_4] : memref<1x128xf32, #tpu.memory_space<vmem>>, vector<1x128xf32>
    %4 = vector.broadcast %3 : vector<1x128xf32> to vector<8x128xf32>
    %5 = arith.addf %2, %4 : vector<8x128xf32>
    %cst_5 = arith.constant 9.99999974E-5 : f32
    %6 = vector.broadcast %cst_5 : f32 to vector<8x128xf32>
    %7 = arith.mulf %6, %5 : vector<8x128xf32>
    %8 = arith.maximumf %5, %7 : vector<8x128xf32>
    %9 = arith.truncf %8 : vector<8x128xf32> to vector<8x128xbf16>
    %c0_6 = arith.constant 0 : index
    %c0_7 = arith.constant 0 : index
    %10 = vector.load %arg4[%c0_6, %c0_7] : memref<128x128xbf16, #tpu.memory_space<vmem>>, vector<128x128xbf16>
    %cst_8 = arith.constant dense<0.000000e+00> : vector<8x128xf32>
    %11 = tpu.matmul %9, %10, %cst_8 {dimension_numbers = #tpu.dot_dimension_numbers<[1], [0], [0], [1], [0, 0, 1, 1], [], []>} : vector<8x128xbf16>, vector<128x128xbf16>, vector<8x128xf32> -> vector<8x128xf32>
    %c0_9 = arith.constant 0 : index
    %c0_10 = arith.constant 0 : index
    %12 = vector.load %arg5[%c0_9, %c0_10] : memref<1x128xf32, #tpu.memory_space<vmem>>, vector<1x128xf32>
    %13 = vector.broadcast %12 : vector<1x128xf32> to vector<8x128xf32>
    %14 = arith.addf %11, %13 : vector<8x128xf32>
    %cst_11 = arith.constant 9.99999974E-5 : f32
    %15 = vector.broadcast %cst_11 : f32 to vector<8x128xf32>
    %16 = arith.mulf %15, %14 : vector<8x128xf32>
    %17 = arith.maximumf %14, %16 : vector<8x128xf32>
    %18 = arith.truncf %17 : vector<8x128xf32> to vector<8x128xbf16>
    %c0_12 = arith.constant 0 : index
    %c0_13 = arith.constant 0 : index
    %19 = vector.load %arg6[%c0_12, %c0_13] : memref<128x128xbf16, #tpu.memory_space<vmem>>, vector<128x128xbf16>
    %cst_14 = arith.constant dense<0.000000e+00> : vector<8x128xf32>
    %20 = tpu.matmul %18, %19, %cst_14 {dimension_numbers = #tpu.dot_dimension_numbers<[1], [0], [0], [1], [0, 0, 1, 1], [], []>} : vector<8x128xbf16>, vector<128x128xbf16>, vector<8x128xf32> -> vector<8x128xf32>
    %c0_15 = arith.constant 0 : index
    %c0_16 = arith.constant 0 : index
    %21 = vector.load %arg7[%c0_15, %c0_16] : memref<1x128xf32, #tpu.memory_space<vmem>>, vector<1x128xf32>
    %22 = vector.broadcast %21 : vector<1x128xf32> to vector<8x128xf32>
    %23 = arith.addf %20, %22 : vector<8x128xf32>
    %cst_17 = arith.constant 9.99999974E-5 : f32
    %24 = vector.broadcast %cst_17 : f32 to vector<8x128xf32>
    %25 = arith.mulf %24, %23 : vector<8x128xf32>
    %26 = arith.maximumf %23, %25 : vector<8x128xf32>
    %27 = arith.truncf %26 : vector<8x128xf32> to vector<8x128xbf16>
    %c0_18 = arith.constant 0 : index
    %c0_19 = arith.constant 0 : index
    %28 = vector.load %arg8[%c0_18, %c0_19] : memref<128x128xbf16, #tpu.memory_space<vmem>>, vector<128x128xbf16>
    %cst_20 = arith.constant dense<0.000000e+00> : vector<8x128xf32>
    %29 = tpu.matmul %27, %28, %cst_20 {dimension_numbers = #tpu.dot_dimension_numbers<[1], [0], [0], [1], [0, 0, 1, 1], [], []>} : vector<8x128xbf16>, vector<128x128xbf16>, vector<8x128xf32> -> vector<8x128xf32>
    %c0_21 = arith.constant 0 : index
    %c0_22 = arith.constant 0 : index
    %30 = vector.load %arg9[%c0_21, %c0_22] : memref<1x128xf32, #tpu.memory_space<vmem>>, vector<1x128xf32>
    %31 = vector.broadcast %30 : vector<1x128xf32> to vector<8x128xf32>
    %32 = arith.addf %29, %31 : vector<8x128xf32>
    %33 = math.tanh %32 : vector<8x128xf32>
    %c0_23 = arith.constant 0 : index
    %c0_24 = arith.constant 0 : index
    %34 = vector.load %arg10[%c0_23, %c0_24] : memref<8x128xf32, #tpu.memory_space<vmem>>, vector<8x128xf32>
    tpu.vector_store %arg10[%c0_23, %c0_24], %33 {strides = array<i32>} : memref<8x128xf32, #tpu.memory_space<vmem>>, vector<8x128xf32>,
    %cst_25 = arith.constant 0.000000e+00 : f32
    %35 = vector.broadcast %cst_25 : f32 to vector<8x128xf32>
    %36 = arith.maximumf %32, %35 : vector<8x128xf32>
    %37 = math.absf %32 : vector<8x128xf32>
    %cst_26 = arith.constant 0.000000e+00 : f32
    %38 = vector.broadcast %cst_26 : f32 to vector<8x128xf32>
    %39 = arith.subf %38, %37 : vector<8x128xf32>
    %40 = math.exp %39 : vector<8x128xf32>
    %41 = math.log1p %40 : vector<8x128xf32>
    %42 = arith.addf %36, %41 : vector<8x128xf32>
    %c0_27 = arith.constant 0 : index
    %c0_28 = arith.constant 0 : index
    %43 = vector.load %arg11[%c0_27, %c0_28] : memref<8x128xf32, #tpu.memory_space<vmem>>, vector<8x128xf32>
    tpu.vector_store %arg11[%c0_27, %c0_28], %42 {strides = array<i32>} : memref<8x128xf32, #tpu.memory_space<vmem>>, vector<8x128xf32>,
    return
  }
  func.func @transform_0(%arg0: i32) -> (i32, i32) {
    %c0_i32 = arith.constant 0 : i32
    %c0_i32_0 = arith.constant 0 : i32
    return %arg0, %c0_i32 : i32, i32
  }
  func.func @transform_1(%arg0: i32) -> (i32, i32) {
    %c0_i32 = arith.constant 0 : i32
    %c0_i32_0 = arith.constant 0 : i32
    %c0_i32_1 = arith.constant 0 : i32
    return %c0_i32, %c0_i32_0 : i32, i32
  }
  func.func @transform_2(%arg0: i32) -> (i32, i32) {
    %c0_i32 = arith.constant 0 : i32
    %c0_i32_0 = arith.constant 0 : i32
    %c0_i32_1 = arith.constant 0 : i32
    return %c0_i32, %c0_i32_0 : i32, i32
  }
  func.func @transform_3(%arg0: i32) -> (i32, i32) {
    %c0_i32 = arith.constant 0 : i32
    %c0_i32_0 = arith.constant 0 : i32
    %c0_i32_1 = arith.constant 0 : i32
    return %c0_i32, %c0_i32_0 : i32, i32
  }
  func.func @transform_4(%arg0: i32) -> (i32, i32) {
    %c0_i32 = arith.constant 0 : i32
    %c0_i32_0 = arith.constant 0 : i32
    %c0_i32_1 = arith.constant 0 : i32
    return %c0_i32, %c0_i32_0 : i32, i32
  }
  func.func @transform_5(%arg0: i32) -> (i32, i32) {
    %c0_i32 = arith.constant 0 : i32
    %c0_i32_0 = arith.constant 0 : i32
    %c0_i32_1 = arith.constant 0 : i32
    return %c0_i32, %c0_i32_0 : i32, i32
  }
  func.func @transform_6(%arg0: i32) -> (i32, i32) {
    %c0_i32 = arith.constant 0 : i32
    %c0_i32_0 = arith.constant 0 : i32
    %c0_i32_1 = arith.constant 0 : i32
    return %c0_i32, %c0_i32_0 : i32, i32
  }
  func.func @transform_7(%arg0: i32) -> (i32, i32) {
    %c0_i32 = arith.constant 0 : i32
    %c0_i32_0 = arith.constant 0 : i32
    %c0_i32_1 = arith.constant 0 : i32
    return %c0_i32, %c0_i32_0 : i32, i32
  }
  func.func @transform_8(%arg0: i32) -> (i32, i32) {
    %c0_i32 = arith.constant 0 : i32
    %c0_i32_0 = arith.constant 0 : i32
    %c0_i32_1 = arith.constant 0 : i32
    return %c0_i32, %c0_i32_0 : i32, i32
  }
  func.func @transform_9(%arg0: i32) -> (i32, i32) {
    %c0_i32 = arith.constant 0 : i32
    %c0_i32_0 = arith.constant 0 : i32
    return %arg0, %c0_i32 : i32, i32
  }
  func.func @transform_10(%arg0: i32) -> (i32, i32) {
    %c0_i32 = arith.constant 0 : i32
    %c0_i32_0 = arith.constant 0 : i32
    return %arg0, %c0_i32 : i32, i32
  }
}

</mosaic_0001>

<bundles_post_ra>
// kernel: tpu_custom_call.1
= control target key start
LH: loop header
LB: loop body
LE: loop exit
PB: predicated region body
PF: predicated region fallthrough
CT: control target
= control target key end

     0   :  { %16 = vsyncpa [#allocation3], 0  ;;  %s1108_s0 = inlined_call_operand.hbm [shape: bf16[8,128], index: 0, kind: input, shape index: {}]   ;;  %s1109_s1 = inlined_call_operand.hbm [shape: bf16[128,128], index: 1, kind: input, shape index: {}]   ;;  %s1110_s2 = inlined_call_operand.vmem [shape: f32[1,128], index: 2, kind: input, shape index: {}]   ;;  %s1111_s3 = inlined_call_operand.hbm [shape: bf16[128,128], index: 3, kind: input, shape index: {}]   ;;  %s1112_s4 = inlined_call_operand.vmem [shape: f32[1,128], index: 4, kind: input, shape index: {}]   ;;  %s1113_s5 = inlined_call_operand.hbm [shape: bf16[128,128], index: 5, kind: input, shape index: {}]   ;;  %s1114_s6 = inlined_call_operand.vmem [shape: f32[1,128], index: 6, kind: input, shape index: {}]   ;;  %s1115_s7 = inlined_call_operand.hbm [shape: bf16[128,128], index: 7, kind: input, shape index: {}]   ;;  %s1116_s8 = inlined_call_operand.vmem [shape: f32[1,128], index: 8, kind: input, shape index: {}]   ;;  %s1117_s9 = inlined_call_operand.hbm [shape: f32[8,128], index: 9, kind: output, shape index: {0}]   ;;  %s1118_s10 = inlined_call_operand.hbm [shape: f32[8,128], index: 10, kind: output, shape index: {1}]  }
   0x1   :  { %17 = vsyncpa [#allocation6], 0 }
   0x2   :  { %18 = vsyncpa [#allocation9], 0 }
   0x3   :  { %19 = vsyncpa [#allocation4], 0 }
   0x4   :  { %20 = vsyncpa [#allocation13], 0  ;;  %s957_s13 = smov [#allocation5]  }
   0x5   :  { %s36_s14 = sshll.u32 %s957_s13, 4  ;;  %s37_s14 = int_to_ptr.vmem [resolvable:$true] %s36_s14 }
   0x6   :  { %s815_s15 = scalar_lea.vmem %s37_s14, 1024  ;;  %p820_p1 = scmp.lt.s32.totalorder %s37_s14, %s37_s14 }
   0x7   :  { %p816_p0 = scmp.ne.s32.totalorder %s37_s14, %s815_s15  ;;  %p821_p2 = scmp.lt.s32.totalorder %s815_s15, %s815_s15 }
   0x9   :  { %p822_p3 = por %p821_p2, %p820_p1 }
   0xb   :  { %p823_p4 = pnand %p822_p3, %p816_p0 }
   0xd   :  { %826 = shalt.err (!%p823_p4)
}
   0xe   :  { %s958_s16 = smov 64   ;;  %s959_s17 = smov 4  }
   0xf   :  { %42 = dma.hbm_to_vmem [thread:$0]  %s1109_s1, 1024, %s37_s14, [#allocation6], %s958_s16, %s958_s16, %s959_s17  }
  0x10   :  { %s960_s20 = smov [#allocation8]   ;;  %s961_s22 = smov [#allocation2]  }
  0x11   :  { %s64_s21 = sshll.u32 %s960_s20, 4  ;;  %s27_s23 = sshll.u32 %s961_s22, 4  ;;  %s65_s21 = int_to_ptr.vmem [resolvable:$true] %s64_s21  ;;  %s28_s23 = int_to_ptr.vmem [resolvable:$true] %s27_s23 }
  0x12   :  { %s835_s24 = scalar_lea.vmem %s65_s21, 1024  ;;  %p840_p6 = scmp.lt.s32.totalorder %s65_s21, %s65_s21 }
  0x13   :  { %p836_p5 = scmp.ne.s32.totalorder %s65_s21, %s835_s24  ;;  %p841_p7 = scmp.lt.s32.totalorder %s835_s24, %s835_s24 }
  0x15   :  { %p842_p8 = por %p841_p7, %p840_p6 }
  0x17   :  { %p843_p9 = pnand %p842_p8, %p836_p5 }
  0x19   :  { %846 = shalt.err (!%p843_p9)
}
  0x1a   :  { %70 = dma.hbm_to_vmem [thread:$0]  %s1113_s5, 1024, %s65_s21, [#allocation9], %s958_s16, %s958_s16, %s959_s17  }
  0x1b   :  { %s855_s1 = scalar_lea.vmem %s28_s23, 64  ;;  %p860_p11 = scmp.lt.s32.totalorder %s28_s23, %s28_s23 }
  0x1c   :  { %p856_p10 = scmp.ne.s32.totalorder %s28_s23, %s855_s1  ;;  %p861_p12 = scmp.lt.s32.totalorder %s855_s1, %s855_s1 }
  0x1e   :  { %p862_p13 = por %p861_p12, %p860_p11 }
  0x20   :  { %p863_p0 = pnand %p862_p13, %p856_p10 }
  0x22   :  { %866 = shalt.err (!%p863_p0)
}
  0x23   :  { %30 = dma.hbm_to_vmem [thread:$0]  %s1108_s0, 64, %s28_s23, [#allocation3]  }
  0x24   :  { %s962_s29 = smov [#allocation7]   ;;  %s963_s11 = smov [#allocation10]  }
  0x25   :  { %s50_s30 = sshll.u32 %s962_s29, 4  ;;  %s78_s12 = sshll.u32 %s963_s11, 4  ;;  %s51_s30 = int_to_ptr.vmem [resolvable:$true] %s50_s30  ;;  %s79_s12 = int_to_ptr.vmem [resolvable:$true] %s78_s12 }
  0x26   :  { %s875_s13 = scalar_lea.vmem %s51_s30, 1024  ;;  %p880_p2 = scmp.lt.s32.totalorder %s51_s30, %s51_s30 }
  0x27   :  { %p876_p1 = scmp.ne.s32.totalorder %s51_s30, %s875_s13  ;;  %p881_p3 = scmp.lt.s32.totalorder %s875_s13, %s875_s13 }
  0x29   :  { %p882_p4 = por %p881_p3, %p880_p2 }
  0x2b   :  { %p883_p5 = pnand %p882_p4, %p876_p1 }
  0x2d   :  { %886 = shalt.err (!%p883_p5)
}
  0x2e   :  { %56 = dma.hbm_to_vmem [thread:$0]  %s1111_s3, 1024, %s51_s30, [#allocation6], %s958_s16, %s958_s16, %s959_s17  }
  0x2f   :  { %s895_s0 = scalar_lea.vmem %s79_s12, 1024  ;;  %p900_p7 = scmp.lt.s32.totalorder %s79_s12, %s79_s12 }
  0x30   :  { %p896_p6 = scmp.ne.s32.totalorder %s79_s12, %s895_s0  ;;  %p901_p8 = scmp.lt.s32.totalorder %s895_s0, %s895_s0 }
  0x32   :  { %p902_p9 = por %p901_p8, %p900_p7 }
  0x34   :  { %p903_p10 = pnand %p902_p9, %p896_p6 }
  0x36   :  { %906 = shalt.err (!%p903_p10)
}
  0x37   :  { %84 = dma.hbm_to_vmem [thread:$0]  %s1115_s7, 1024, %s79_s12, [#allocation9], %s958_s16, %s958_s16, %s959_s17  }
  0x38   :  { %947 = dma.done.wait [#allocation3], 64  }
  0x39   :  { %948 = vsyncadd [#allocation3], 4294967232 }
  0x3a   :  { %949 = dma.done.wait [#allocation6], 2048  }
  0x3b   :  { %950 = vsyncadd [#allocation6], 4294965248 }
  0x3c   :  { %951 = dma.done.wait [#allocation9], 2048  }
  0x3d   :  { %952 = vsyncadd [#allocation9], 4294965248  ;;  %v964_v0 = vmov 0.0   ;;  %vm965_vm0 = vmmov 0   ;;  %v769_v1 = vld [vmem:[#allocation5 + $0x38] sm:$0xff]   ;;  %v770_v2 = vld [vmem:[#allocation5 + $0x30] sm:$0xff]  }
  0x3e   :  { %678 = vmatprep.subr.bf16.mxu0 %v964_v0  ;;  %694 = vmatprep.mubr.msk.bf16.mxu0 %vm965_vm0, %v964_v0  ;;  %v771_v3 = vld [vmem:[#allocation5 + $0x28] sm:$0xff]   ;;  %v777_v4 = vld [vmem:[#allocation7 + $0x38] sm:$0xff]   ;;  %v772_v5 = vld [vmem:[#allocation5 + $0x20] sm:$0xff]  }
  0x3f   :  { %698 = vmatprep.subr.bf16.mxu1 %v964_v0  ;;  %714 = vmatprep.mubr.msk.bf16.mxu1 %vm965_vm0, %v964_v0  ;;  %v778_v6 = vld [vmem:[#allocation7 + $0x30] sm:$0xff]   ;;  %v773_v7 = vld [vmem:[#allocation5 + $0x18] sm:$0xff]   ;;  %v779_v8 = vld [vmem:[#allocation7 + $0x28] sm:$0xff]  }
  0x40   :  { %679 = vmatpush3.bf16.msra.mxu0 %v769_v1  ;;  %699 = vmatpush3.bf16.msra.mxu1 %v777_v4  ;;  %v774_v9 = vld [vmem:[#allocation5 + $0x10] sm:$0xff]   ;;  %v780_v10 = vld [vmem:[#allocation7 + $0x20] sm:$0xff]   ;;  %v775_v11 = vld [vmem:[#allocation5 + $0x8] sm:$0xff]  }
  0x41   :  { %680 = vmatprep.subr.bf16.mxu0 %v964_v0  ;;  %700 = vmatprep.subr.bf16.mxu1 %v964_v0  ;;  %v781_v12 = vld [vmem:[#allocation7 + $0x18] sm:$0xff]   ;;  %v776_v13 = vld [vmem:[#allocation5] sm:$0xff]   ;;  %v782_v14 = vld [vmem:[#allocation7 + $0x10] sm:$0xff]  }
  0x42   :  { %v103_v15 = vld [vmem:[#allocation2] sm:$0xf]  ;;  %v783_v16 = vld [vmem:[#allocation7 + $0x8] sm:$0xff]   ;;  %v784_v17 = vld [vmem:[#allocation7] sm:$0xff]  }
  0x43   :  { %v785_v18 = vld [vmem:[#allocation8 + $0x38] sm:$0xff]   ;;  %v786_v19 = vld [vmem:[#allocation8 + $0x30] sm:$0xff]   ;;  %v787_v20 = vld [vmem:[#allocation8 + $0x28] sm:$0xff]  }
  0x44   :  { %681 = vmatpush3.bf16.msra.mxu0 %v770_v2  ;;  %701 = vmatpush3.bf16.msra.mxu1 %v778_v6  ;;  %v788_v21 = vld [vmem:[#allocation8 + $0x20] sm:$0xff]   ;;  %v789_v22 = vld [vmem:[#allocation8 + $0x18] sm:$0xff]   ;;  %v790_v23 = vld [vmem:[#allocation8 + $0x10] sm:$0xff]  }
  0x45   :  { %682 = vmatprep.subr.bf16.mxu0 %v964_v0  ;;  %702 = vmatprep.subr.bf16.mxu1 %v964_v0  ;;  %v606_v24 = vld [vmem:[%s1110_s2] ss:$0 sm:$0xff]  ;;  %v791_v33 = vld [vmem:[#allocation8 + $0x8] sm:$0xff]   ;;  %v792_v34 = vld [vmem:[#allocation8] sm:$0xff]  }
  0x46   :  { %v793_v35 = vld [vmem:[#allocation10 + $0x38] sm:$0xff]   ;;  %v794_v36 = vld [vmem:[#allocation10 + $0x30] sm:$0xff]   ;;  %v795_v37 = vld [vmem:[#allocation10 + $0x28] sm:$0xff]  }
  0x47   :  { %v796_v38 = vld [vmem:[#allocation10 + $0x20] sm:$0xff]   ;;  %v797_v39 = vld [vmem:[#allocation10 + $0x18] sm:$0xff]   ;;  %v798_v40 = vld [vmem:[#allocation10 + $0x10] sm:$0xff]  }
  0x48   :  { %683 = vmatpush3.bf16.msra.mxu0 %v771_v3  ;;  %703 = vmatpush3.bf16.msra.mxu1 %v779_v8  ;;  %v615_v41 = vld [vmem:[%s1112_s4] ss:$0 sm:$0xff]  ;;  %v799_v50 = vld [vmem:[#allocation10 + $0x8] sm:$0xff]   ;;  %v800_v51 = vld [vmem:[#allocation10] sm:$0xff]  }
  0x49   :  { %684 = vmatprep.subr.bf16.mxu0 %v964_v0  ;;  %704 = vmatprep.subr.bf16.mxu1 %v964_v0  ;;  %v624_v52 = vld [vmem:[%s1114_s6] ss:$0 sm:$0xff]  ;;  %s966_s6 = smov [#allocation11]  }
  0x4a   :  { %v633_v61 = vld [vmem:[%s1116_s8] ss:$0 sm:$0xff]  ;;  %s581_s21 = sshll.u32 %s966_s6, 4  ;;  %s582_s21 = int_to_ptr.vmem [resolvable:$true] %s581_s21 }
  0x4b   :  { %s907_s22 = scalar_lea.vmem %s582_s21, 128  ;;  %p912_p12 = scmp.lt.s32.totalorder %s582_s21, %s582_s21 }
  0x4c   :  { %685 = vmatpush3.bf16.msra.mxu0 %v772_v5  ;;  %705 = vmatpush3.bf16.msra.mxu1 %v780_v10  ;;  %p908_p11 = scmp.ne.s32.totalorder %s582_s21, %s907_s22  ;;  %p913_p13 = scmp.lt.s32.totalorder %s907_s22, %s907_s22 }
  0x4d   :  { %686 = vmatprep.subr.bf16.mxu0 %v964_v0  ;;  %706 = vmatprep.subr.bf16.mxu1 %v964_v0 }
  0x4e   :  { %p914_p0 = por %p913_p13, %p912_p12 }
  0x50   :  { %687 = vmatpush3.bf16.msra.mxu0 %v773_v7  ;;  %707 = vmatpush3.bf16.msra.mxu1 %v781_v12  ;;  %p915_p1 = pnand %p914_p0, %p908_p11 }
  0x51   :  { %688 = vmatprep.subr.bf16.mxu0 %v964_v0  ;;  %708 = vmatprep.subr.bf16.mxu1 %v964_v0 }
  0x54   :  { %689 = vmatpush3.bf16.msra.mxu0 %v774_v9  ;;  %709 = vmatpush3.bf16.msra.mxu1 %v782_v14 }
  0x55   :  { %690 = vmatprep.subr.bf16.mxu0 %v964_v0  ;;  %710 = vmatprep.subr.bf16.mxu1 %v964_v0 }
  0x58   :  { %691 = vmatpush3.bf16.msra.mxu0 %v775_v11  ;;  %711 = vmatpush3.bf16.msra.mxu1 %v783_v16 }
  0x59   :  { %692 = vmatprep.subr.bf16.mxu0 %v964_v0  ;;  %712 = vmatprep.subr.bf16.mxu1 %v964_v0 }
  0x5c   :  { %693 = vmatpush3.bf16.msra.mxu0 %v776_v13  ;;  %713 = vmatpush3.bf16.msra.mxu1 %v784_v17 }
  0x5d   :  { %718 = vmatprep.subr.bf16.mxu0 %v964_v0  ;;  %738 = vmatprep.subr.bf16.mxu1 %v964_v0 }
  0x5f   :  { %695 = vmatmul.mubr.bf16.vlgmr.msra.gmra.mxu0 %v103_v15 }
  0x60   :  { %734 = vmatprep.mubr.msk.bf16.mxu0 %vm965_vm0, %v964_v0  ;;  %719 = vmatpush3.bf16.msra.mxu0 %v785_v18 }
  0x61   :  { %720 = vmatprep.subr.bf16.mxu0 %v964_v0 }
  0x64   :  { %721 = vmatpush3.bf16.msra.mxu0 %v786_v19 }
  0x65   :  { %722 = vmatprep.subr.bf16.mxu0 %v964_v0 }
  0x68   :  { %723 = vmatpush3.bf16.msra.mxu0 %v787_v20 }
  0x69   :  { %724 = vmatprep.subr.bf16.mxu0 %v964_v0 }
  0x6c   :  { %725 = vmatpush3.bf16.msra.mxu0 %v788_v21 }
  0x6d   :  { %726 = vmatprep.subr.bf16.mxu0 %v964_v0 }
  0x70   :  { %727 = vmatpush3.bf16.msra.mxu0 %v789_v22 }
  0x71   :  { %728 = vmatprep.subr.bf16.mxu0 %v964_v0 }
  0x74   :  { %729 = vmatpush3.bf16.msra.mxu0 %v790_v23 }
  0x75   :  { %730 = vmatprep.subr.bf16.mxu0 %v964_v0 }
  0x78   :  { %731 = vmatpush3.bf16.msra.mxu0 %v791_v33 }
  0x79   :  { %732 = vmatprep.subr.bf16.mxu0 %v964_v0 }
  0x7c   :  { %733 = vmatpush3.bf16.msra.mxu0 %v792_v34 }
 0x11f   :  { %v209_v25 = vpop.f32.mrf.mxu0 }
 0x120   :  { %v210_v26 = vadd.f32 %v606_v24, %v209_v25 }
 0x121   :  { %v696_v27 = vpop.f32.mrf.mxu0 }
 0x122   :  { %v215_v28 = vmul.f32 0.0001, %v210_v26 }
 0x123   :  { %v212_v29 = vpop.f32.mrf.mxu0 }
 0x124   :  { %v216_v30 = vmax.f32 %v210_v26, %v215_v28 }
 0x125   :  { %v697_v31 = vpop.f32.mrf.mxu0 }
 0x126   :  { %v217_v32 = vpack.c.bf16 %v216_v30, %v216_v30 }
 0x128   :  { %715 = vmatmul.mubr.bf16.vlgmr.msra.gmra.mxu1 %v217_v32 }
 0x129   :  { %754 = vmatprep.mubr.msk.bf16.mxu1 %vm965_vm0, %v964_v0  ;;  %739 = vmatpush3.bf16.msra.mxu1 %v793_v35 }
 0x12a   :  { %740 = vmatprep.subr.bf16.mxu1 %v964_v0 }
 0x12d   :  { %741 = vmatpush3.bf16.msra.mxu1 %v794_v36 }
 0x12e   :  { %742 = vmatprep.subr.bf16.mxu1 %v964_v0 }
 0x131   :  { %743 = vmatpush3.bf16.msra.mxu1 %v795_v37 }
 0x132   :  { %744 = vmatprep.subr.bf16.mxu1 %v964_v0 }
 0x135   :  { %745 = vmatpush3.bf16.msra.mxu1 %v796_v38 }
 0x136   :  { %746 = vmatprep.subr.bf16.mxu1 %v964_v0 }
 0x139   :  { %747 = vmatpush3.bf16.msra.mxu1 %v797_v39 }
 0x13a   :  { %748 = vmatprep.subr.bf16.mxu1 %v964_v0 }
 0x13d   :  { %749 = vmatpush3.bf16.msra.mxu1 %v798_v40 }
 0x13e   :  { %750 = vmatprep.subr.bf16.mxu1 %v964_v0 }
 0x141   :  { %751 = vmatpush3.bf16.msra.mxu1 %v799_v50 }
 0x142   :  { %752 = vmatprep.subr.bf16.mxu1 %v964_v0 }
 0x145   :  { %753 = vmatpush3.bf16.msra.mxu1 %v800_v51 }
 0x1e8   :  { %v323_v42 = vpop.f32.mrf.mxu1 }
 0x1e9   :  { %v324_v43 = vadd.f32 %v615_v41, %v323_v42 }
 0x1ea   :  { %v716_v44 = vpop.f32.mrf.mxu1 }
 0x1eb   :  { %v329_v45 = vmul.f32 0.0001, %v324_v43 }
 0x1ec   :  { %v326_v46 = vpop.f32.mrf.mxu1 }
 0x1ed   :  { %v330_v47 = vmax.f32 %v324_v43, %v329_v45 }
 0x1ee   :  { %v717_v48 = vpop.f32.mrf.mxu1 }
 0x1ef   :  { %v331_v49 = vpack.c.bf16 %v330_v47, %v330_v47 }
 0x1f1   :  { %735 = vmatmul.mubr.bf16.vlgmr.msra.gmra.mxu0 %v331_v49 }
 0x2b1   :  { %v437_v53 = vpop.f32.mrf.mxu0 }
 0x2b2   :  { %v438_v54 = vadd.f32 %v624_v52, %v437_v53 }
 0x2b3   :  { %v736_v55 = vpop.f32.mrf.mxu0 }
 0x2b4   :  { %v443_v56 = vmul.f32 0.0001, %v438_v54 }
 0x2b5   :  { %v440_v57 = vpop.f32.mrf.mxu0 }
 0x2b6   :  { %v444_v58 = vmax.f32 %v438_v54, %v443_v56 }
 0x2b7   :  { %v737_v59 = vpop.f32.mrf.mxu0 }
 0x2b8   :  { %v445_v60 = vpack.c.bf16 %v444_v58, %v444_v58 }
 0x2ba   :  { %755 = vmatmul.mubr.bf16.vlgmr.msra.gmra.mxu1 %v445_v60 }
 0x37a   :  { %v551_v62 = vpop.f32.mrf.mxu1 }
 0x37b   :  { %v552_v63 = vadd.f32 %v633_v61, %v551_v62 }
 0x37c   :  { %v756_v0 = vpop.f32.mrf.mxu1 }
 0x37d   :  { %801 = vtanh.f32 %v552_v63  ;;  %v560_v1 = vand.u32 2147483647, %v552_v63 }
 0x37e   :  { %v554_v2 = vpop.f32.mrf.mxu1 }
 0x37f   :  { %v561_v3 = vsub.f32 0.0, %v560_v1 }
 0x380   :  { %v757_v4 = vpop.f32.mrf.mxu1 }
 0x381   :  { %v562_v5 = vmul.f32 1.442695, %v561_v3 }
 0x383   :  { %803 = vpow2.f32 %v562_v5 }
 0x38a   :  { %v802_v6 = vpop.eup %801 }
 0x38b   :  { %558 = vst [vmem:[#allocation11] sm:$0xff] %v802_v6 }
 0x38c   :  { %918 = shalt.err (!%p915_p1)
}
 0x38d   :  { %584 = dma.vmem_to_hbm [thread:$0]  %s582_s21, 128, %s1117_s9, [#allocation4]   ;;  %v559_v15 = vmax.f32 %v552_v63, 0.0 }
 0x38e   :  { %s967_s24 = smov [#allocation12]  }
 0x38f   :  { %s591_s25 = sshll.u32 %s967_s24, 4  ;;  %s592_s25 = int_to_ptr.vmem [resolvable:$true] %s591_s25 }
 0x390   :  { %v804_v7 = vpop.eup %803  ;;  %s927_s26 = scalar_lea.vmem %s592_s25, 128  ;;  %p932_p3 = scmp.lt.s32.totalorder %s592_s25, %s592_s25 }
 0x391   :  { %v564_v8 = vadd.f32 1.0, %v804_v7  ;;  %v567_v9 = vmul.f32 -0.5, %v804_v7  ;;  %v570_v11 = vand.u32 2147483647, %v804_v7  ;;  %p928_p2 = scmp.ne.s32.totalorder %s592_s25, %s927_s26  ;;  %p933_p4 = scmp.lt.s32.totalorder %s927_s26, %s927_s26 }
 0x393   :  { %805 = vlog2.f32 %v564_v8  ;;  %v568_v10 = vadd.f32 1.0, %v567_v9  ;;  %vm571_vm1 = vcmp.lt.f32.partialorder %v570_v11, 0.0004427343  ;;  %p934_p5 = por %p933_p4, %p932_p3 }
 0x395   :  { %v569_v14 = vmul.f32 %v804_v7, %v568_v10  ;;  %p935_p6 = pnand %p934_p5, %p928_p2 }
 0x3a0   :  { %v806_v12 = vpop.eup %805 }
 0x3a1   :  { %v566_v13 = vmul.f32 0.6931472, %v806_v12 }
 0x3a3   :  { %v572_v16 = vsel %vm571_vm1, %v569_v14, %v566_v13 }
 0x3a4   :  { %v573_v17 = vadd.f32 %v572_v16, %v559_v15 }
 0x3a6   :  { %574 = vst [vmem:[#allocation12] sm:$0xff] %v573_v17 }
 0x3a7   :  { %938 = shalt.err (!%p935_p6)
}
 0x3a8   :  { %594 = dma.vmem_to_hbm [thread:$0]  %s592_s25, 128, %s1118_s10, [#allocation13]  }
 0x3a9   :  { %953 = dma.done.wait [#allocation4], 128  }
 0x3aa   :  { %954 = vsyncadd [#allocation4], 4294967168 }
 0x3ab   :  { %955 = dma.done.wait [#allocation13], 128  }
 0x3ac   :  { %956 = vsyncadd [#allocation13], 4294967168 }
 0x3ad   :  { %601 = vsyncpa [#allocation3], 1 }
 0x3ae   :  { %602 = vsyncpa [#allocation6], 1 }
 0x3af   :  { %603 = vsyncpa [#allocation9], 1 }
 0x3b0   :  { %604 = vsyncpa [#allocation4], 1 }
 0x3b1   :  { %605 = vsyncpa [#allocation13], 1 }

</bundles_post_ra>
